<compile_context>
chip_gen: v7x
topology: tpu7x:2x2x1
jax: 0.10.0
libtpu: 0.0.40
codegen_flags: <defaults>
</compile_context>

<pallas_src>
import jax
import jax.numpy as jnp
from jax.experimental import pallas as pl
from jax.experimental.pallas import tpu as pltpu

_LANE = 128
_SUBLANE = 8
_ROWS_TILE_HINT = 1024   # 1024 rows * 128 lanes = 128K elements per tile row


def _round_up(v, m):
    return ((v + m - 1) // m) * m


def _linear_kernel(w_ref, b_ref, x_ref, o_ref):
    """o[0, n] = w[n,0]*x[0] + w[n,1]*x[1] + b[n];   o[1, n] = b[n].

    w_ref: (N, 2) f32 in SMEM          b_ref: (N,) f32 in SMEM
    x_ref: (2, rows_tile, 128) VMEM    o_ref: (2, N, rows_tile, 128) VMEM
    All VMEM tiles are lane-dense full (8,128) vregs -> unmasked vld/vst.
    """
    x0 = x_ref[0, :, :]                       # (rows_tile, 128)
    x1 = x_ref[1, :, :]
    n_out = o_ref.shape[1]                    # N = 3, static unroll
    for n in range(n_out):
        acc = x0 * w_ref[n, 0] + x1 * w_ref[n, 1] + b_ref[n]
        o_ref[0, n, :, :] = acc.astype(o_ref.dtype)
        # Slot 1: Linear(empty_like -> treated as zeros) == bias broadcast.
        bias_blk = jnp.full(x0.shape, b_ref[n], dtype=jnp.float32)
        o_ref[1, n, :, :] = bias_blk.astype(o_ref.dtype)


def _pallas_linear_folded(x_f, weight_f32, bias_f32, *, rows_tile):
    """out(2, N, rows_pad, 128): slot 0 = W @ x + b, slot 1 = bias broadcast."""
    K, rows_pad, lane = x_f.shape
    N = weight_f32.shape[0]
    grid = (rows_pad // rows_tile,)
    return pl.pallas_call(
        _linear_kernel,
        out_shape=jax.ShapeDtypeStruct((2, N, rows_pad, lane), x_f.dtype),
        grid=grid,
        in_specs=[
            pl.BlockSpec(memory_space=pltpu.MemorySpace.SMEM),      # weight (N,2)
            pl.BlockSpec(memory_space=pltpu.MemorySpace.SMEM),      # bias (N,)
            pl.BlockSpec((K, rows_tile, lane), lambda i: (0, i, 0)),
        ],
        out_specs=pl.BlockSpec((2, N, rows_tile, lane), lambda i: (0, 0, i, 0)),
        compiler_params=pltpu.CompilerParams(
            dimension_semantics=("parallel",),
            vmem_limit_bytes=32 * 1024 * 1024,
        ),
    )(weight_f32, bias_f32, x_f)


def module_a_forward(x, weight, bias):
    """Reproduces ModuleA.forward.

    x: (B, C, 2), C even.
      v1, v2 = chunk(x, 2, dim=1)                  -> each (B, C//2, 2)
      stacked = stack([v1, empty_like(v2)], dim=1) -> (B, 2, C//2, 2)
      out = Linear(2, 3)(stacked)                  -> (B, 2, C//2, 3)
    """
    B, C, K = x.shape
    assert K == 2 and C % 2 == 0
    half = C // 2
    N = weight.shape[0]
    M = B * half

    # Slot-0 activations (v1), lane-dense (2, M).
    # TODO(synk): the (M,2)->(2,M) transpose is one extra HBM pass; an in-kernel
    # even/odd lane de-interleave (pltpu.roll + where) could remove it.
    v1 = x[:, :half, :].reshape(M, K)
    x_t = v1.T                                                    # (2, M)

    # Fold M into (rows, 128) blocks; pad so the tile divides evenly.
    rows = -(-M // _LANE)
    rows_tile = max(
        _SUBLANE,
        min(_round_up(rows, _SUBLANE), _round_up(_ROWS_TILE_HINT, _SUBLANE)),
    )
    rows_pad = _round_up(max(rows, 1), rows_tile)
    m_pad = rows_pad * _LANE
    if m_pad != M:
        x_t = jnp.pad(x_t, ((0, 0), (0, m_pad - M)))
    x_f = x_t.reshape(K, rows_pad, _LANE)

    out_f = _pallas_linear_folded(
        x_f, weight.astype(jnp.float32), bias.astype(jnp.float32),
        rows_tile=rows_tile)                                      # (2, N, rows_pad, 128)

    # (2, N, M) -> (B, 2, half, N): single layout pass.
    out_flat = out_f.reshape(2, N, m_pad)[:, :, :M]
    return out_flat.reshape(2, N, B, half).transpose(2, 0, 3, 1)


if __name__ == "__main__":
    key = jax.random.PRNGKey(0)
    k_x, k_w, k_b = jax.random.split(key, 3)

    # Module-consistent small shapes: last dim = 2 (Linear in_features),
    # dim=1 even (chunk into 2).
    B, C, K = 4, 8, 2
    x = jax.random.normal(k_x, (B, C, K), dtype=jnp.float32)

    # Linear(2, 3) parameters in PyTorch layout: weight (3, 2), bias (3,)
    weight = jax.random.normal(k_w, (3, 2), dtype=jnp.float32) * 0.5
    bias = jax.random.normal(k_b, (3,), dtype=jnp.float32) * 0.1

    fwd = jax.jit(module_a_forward)
    out = jax.block_until_ready(fwd(x, weight, bias))
    assert out.shape == (B, 2, C // 2, 3), out.shape

    # Pure-JAX reference (same semantics: empty_like half -> Linear(0) = bias).
    half = C // 2
    ref_first = x[:, :half, :] @ weight.T + bias
    ref_second = jnp.broadcast_to(bias.reshape(1, 1, 3), (B, half, 3))
    ref = jnp.stack([ref_first, ref_second], axis=1)
    assert jnp.allclose(out, ref, atol=1e-5), "mismatch vs reference"

    print("KERNEL_OK")
</pallas_src>

<mosaic_0001>
module attributes {stable_mosaic.version = 11 : i64} {
  func.func @_linear_kernel(%arg0: i32, %arg1: memref<3x2xf32, #tpu.memory_space<smem>>, %arg2: memref<3xf32, #tpu.memory_space<smem>>, %arg3: memref<2x8x128xf32, #tpu.memory_space<vmem>>, %arg4: memref<2x3x8x128xf32, #tpu.memory_space<vmem>>) attributes {dimension_semantics = [#tpu.dimension_semantics<parallel>], iteration_bounds = array<i64: 1>, scalar_prefetch = 0 : i64, scratch_operands = 0 : i64, tpu.core_type = #tpu.core_type<tc>, window_params = [{transform_indices = @transform_0, window_bounds = array<i64: 3, 2>}, {transform_indices = @transform_1, window_bounds = array<i64: 3>}, {transform_indices = @transform_2, window_bounds = array<i64: 2, 8, 128>}, {transform_indices = @transform_3, window_bounds = array<i64: 2, 3, 8, 128>}]} {
    %c0 = arith.constant 0 : index
    %c0_0 = arith.constant 0 : index
    %c0_1 = arith.constant 0 : index
    %0 = vector.load %arg3[%c0, %c0_0, %c0_1] : memref<2x8x128xf32, #tpu.memory_space<vmem>>, vector<1x8x128xf32>
    %1 = vector.shape_cast %0 : vector<1x8x128xf32> to vector<8x128xf32>
    %c1 = arith.constant 1 : index
    %c0_2 = arith.constant 0 : index
    %c0_3 = arith.constant 0 : index
    %2 = vector.load %arg3[%c1, %c0_2, %c0_3] : memref<2x8x128xf32, #tpu.memory_space<vmem>>, vector<1x8x128xf32>
    %3 = vector.shape_cast %2 : vector<1x8x128xf32> to vector<8x128xf32>
    %c0_4 = arith.constant 0 : index
    %c0_5 = arith.constant 0 : index
    %4 = memref.load %arg1[%c0_4, %c0_5] : memref<3x2xf32, #tpu.memory_space<smem>>
    %5 = vector.broadcast %4 : f32 to vector<8x128xf32>
    %6 = arith.mulf %1, %5 : vector<8x128xf32>
    %c0_6 = arith.constant 0 : index
    %c1_7 = arith.constant 1 : index
    %7 = memref.load %arg1[%c0_6, %c1_7] : memref<3x2xf32, #tpu.memory_space<smem>>
    %8 = vector.broadcast %7 : f32 to vector<8x128xf32>
    %9 = arith.mulf %3, %8 : vector<8x128xf32>
    %10 = arith.addf %6, %9 : vector<8x128xf32>
    %c0_8 = arith.constant 0 : index
    %11 = memref.load %arg2[%c0_8] : memref<3xf32, #tpu.memory_space<smem>>
    %12 = vector.broadcast %11 : f32 to vector<8x128xf32>
    %13 = arith.addf %10, %12 : vector<8x128xf32>
    %c0_9 = arith.constant 0 : index
    %c0_10 = arith.constant 0 : index
    %c0_11 = arith.constant 0 : index
    %c0_12 = arith.constant 0 : index
    %14 = vector.load %arg4[%c0_9, %c0_10, %c0_11, %c0_12] : memref<2x3x8x128xf32, #tpu.memory_space<vmem>>, vector<1x1x8x128xf32>
    %15 = vector.shape_cast %14 : vector<1x1x8x128xf32> to vector<8x128xf32>
    %16 = vector.shape_cast %13 : vector<8x128xf32> to vector<1x1x8x128xf32>
    tpu.vector_store %arg4[%c0_9, %c0_10, %c0_11, %c0_12], %16 {strides = array<i32>} : memref<2x3x8x128xf32, #tpu.memory_space<vmem>>, vector<1x1x8x128xf32>,
    %c0_13 = arith.constant 0 : index
    %17 = memref.load %arg2[%c0_13] : memref<3xf32, #tpu.memory_space<smem>>
    %18 = vector.broadcast %17 : f32 to vector<8x128xf32>
    %c1_14 = arith.constant 1 : index
    %c0_15 = arith.constant 0 : index
    %c0_16 = arith.constant 0 : index
    %c0_17 = arith.constant 0 : index
    %19 = vector.load %arg4[%c1_14, %c0_15, %c0_16, %c0_17] : memref<2x3x8x128xf32, #tpu.memory_space<vmem>>, vector<1x1x8x128xf32>
    %20 = vector.shape_cast %19 : vector<1x1x8x128xf32> to vector<8x128xf32>
    %21 = vector.shape_cast %18 : vector<8x128xf32> to vector<1x1x8x128xf32>
    tpu.vector_store %arg4[%c1_14, %c0_15, %c0_16, %c0_17], %21 {strides = array<i32>} : memref<2x3x8x128xf32, #tpu.memory_space<vmem>>, vector<1x1x8x128xf32>,
    %c1_18 = arith.constant 1 : index
    %c0_19 = arith.constant 0 : index
    %22 = memref.load %arg1[%c1_18, %c0_19] : memref<3x2xf32, #tpu.memory_space<smem>>
    %23 = vector.broadcast %22 : f32 to vector<8x128xf32>
    %24 = arith.mulf %1, %23 : vector<8x128xf32>
    %c1_20 = arith.constant 1 : index
    %c1_21 = arith.constant 1 : index
    %25 = memref.load %arg1[%c1_20, %c1_21] : memref<3x2xf32, #tpu.memory_space<smem>>
    %26 = vector.broadcast %25 : f32 to vector<8x128xf32>
    %27 = arith.mulf %3, %26 : vector<8x128xf32>
    %28 = arith.addf %24, %27 : vector<8x128xf32>
    %c1_22 = arith.constant 1 : index
    %29 = memref.load %arg2[%c1_22] : memref<3xf32, #tpu.memory_space<smem>>
    %30 = vector.broadcast %29 : f32 to vector<8x128xf32>
    %31 = arith.addf %28, %30 : vector<8x128xf32>
    %c0_23 = arith.constant 0 : index
    %c1_24 = arith.constant 1 : index
    %c0_25 = arith.constant 0 : index
    %c0_26 = arith.constant 0 : index
    %32 = vector.load %arg4[%c0_23, %c1_24, %c0_25, %c0_26] : memref<2x3x8x128xf32, #tpu.memory_space<vmem>>, vector<1x1x8x128xf32>
    %33 = vector.shape_cast %32 : vector<1x1x8x128xf32> to vector<8x128xf32>
    %34 = vector.shape_cast %31 : vector<8x128xf32> to vector<1x1x8x128xf32>
    tpu.vector_store %arg4[%c0_23, %c1_24, %c0_25, %c0_26], %34 {strides = array<i32>} : memref<2x3x8x128xf32, #tpu.memory_space<vmem>>, vector<1x1x8x128xf32>,
    %c1_27 = arith.constant 1 : index
    %35 = memref.load %arg2[%c1_27] : memref<3xf32, #tpu.memory_space<smem>>
    %36 = vector.broadcast %35 : f32 to vector<8x128xf32>
    %c1_28 = arith.constant 1 : index
    %c1_29 = arith.constant 1 : index
    %c0_30 = arith.constant 0 : index
    %c0_31 = arith.constant 0 : index
    %37 = vector.load %arg4[%c1_28, %c1_29, %c0_30, %c0_31] : memref<2x3x8x128xf32, #tpu.memory_space<vmem>>, vector<1x1x8x128xf32>
    %38 = vector.shape_cast %37 : vector<1x1x8x128xf32> to vector<8x128xf32>
    %39 = vector.shape_cast %36 : vector<8x128xf32> to vector<1x1x8x128xf32>
    tpu.vector_store %arg4[%c1_28, %c1_29, %c0_30, %c0_31], %39 {strides = array<i32>} : memref<2x3x8x128xf32, #tpu.memory_space<vmem>>, vector<1x1x8x128xf32>,
    %c2 = arith.constant 2 : index
    %c0_32 = arith.constant 0 : index
    %40 = memref.load %arg1[%c2, %c0_32] : memref<3x2xf32, #tpu.memory_space<smem>>
    %41 = vector.broadcast %40 : f32 to vector<8x128xf32>
    %42 = arith.mulf %1, %41 : vector<8x128xf32>
    %c2_33 = arith.constant 2 : index
    %c1_34 = arith.constant 1 : index
    %43 = memref.load %arg1[%c2_33, %c1_34] : memref<3x2xf32, #tpu.memory_space<smem>>
    %44 = vector.broadcast %43 : f32 to vector<8x128xf32>
    %45 = arith.mulf %3, %44 : vector<8x128xf32>
    %46 = arith.addf %42, %45 : vector<8x128xf32>
    %c2_35 = arith.constant 2 : index
    %47 = memref.load %arg2[%c2_35] : memref<3xf32, #tpu.memory_space<smem>>
    %48 = vector.broadcast %47 : f32 to vector<8x128xf32>
    %49 = arith.addf %46, %48 : vector<8x128xf32>
    %c0_36 = arith.constant 0 : index
    %c2_37 = arith.constant 2 : index
    %c0_38 = arith.constant 0 : index
    %c0_39 = arith.constant 0 : index
    %50 = vector.load %arg4[%c0_36, %c2_37, %c0_38, %c0_39] : memref<2x3x8x128xf32, #tpu.memory_space<vmem>>, vector<1x1x8x128xf32>
    %51 = vector.shape_cast %50 : vector<1x1x8x128xf32> to vector<8x128xf32>
    %52 = vector.shape_cast %49 : vector<8x128xf32> to vector<1x1x8x128xf32>
    tpu.vector_store %arg4[%c0_36, %c2_37, %c0_38, %c0_39], %52 {strides = array<i32>} : memref<2x3x8x128xf32, #tpu.memory_space<vmem>>, vector<1x1x8x128xf32>,
    %c2_40 = arith.constant 2 : index
    %53 = memref.load %arg2[%c2_40] : memref<3xf32, #tpu.memory_space<smem>>
    %54 = vector.broadcast %53 : f32 to vector<8x128xf32>
    %c1_41 = arith.constant 1 : index
    %c2_42 = arith.constant 2 : index
    %c0_43 = arith.constant 0 : index
    %c0_44 = arith.constant 0 : index
    %55 = vector.load %arg4[%c1_41, %c2_42, %c0_43, %c0_44] : memref<2x3x8x128xf32, #tpu.memory_space<vmem>>, vector<1x1x8x128xf32>
    %56 = vector.shape_cast %55 : vector<1x1x8x128xf32> to vector<8x128xf32>
    %57 = vector.shape_cast %54 : vector<8x128xf32> to vector<1x1x8x128xf32>
    tpu.vector_store %arg4[%c1_41, %c2_42, %c0_43, %c0_44], %57 {strides = array<i32>} : memref<2x3x8x128xf32, #tpu.memory_space<vmem>>, vector<1x1x8x128xf32>,
    return
  }
  func.func @transform_0(%arg0: i32) -> (i32, i32) {
    %c0_i32 = arith.constant 0 : i32
    %c0_i32_0 = arith.constant 0 : i32
    %c0_i32_1 = arith.constant 0 : i32
    return %c0_i32, %c0_i32_0 : i32, i32
  }
  func.func @transform_1(%arg0: i32) -> i32 {
    %c0_i32 = arith.constant 0 : i32
    %c0_i32_0 = arith.constant 0 : i32
    return %c0_i32 : i32
  }
  func.func @transform_2(%arg0: i32) -> (i32, i32, i32) {
    %c0_i32 = arith.constant 0 : i32
    %c0_i32_0 = arith.constant 0 : i32
    %c0_i32_1 = arith.constant 0 : i32
    return %c0_i32, %arg0, %c0_i32_0 : i32, i32, i32
  }
  func.func @transform_3(%arg0: i32) -> (i32, i32, i32, i32) {
    %c0_i32 = arith.constant 0 : i32
    %c0_i32_0 = arith.constant 0 : i32
    %c0_i32_1 = arith.constant 0 : i32
    %c0_i32_2 = arith.constant 0 : i32
    return %c0_i32, %c0_i32_0, %arg0, %c0_i32_1 : i32, i32, i32, i32
  }
}

</mosaic_0001>

<bundles_post_ra>
// kernel: module_a_forward.1
= control target key start
LH: loop header
LB: loop body
LE: loop exit
PB: predicated region body
PF: predicated region fallthrough
CT: control target
= control target key end

     0   :  { %8 = vsyncpa [#allocation3], 0  ;;  %s192_s0 = inlined_call_operand.vmem [shape: f32[3,2], index: 0, kind: input, shape index: {}]   ;;  %s193_s1 = inlined_call_operand.vmem [shape: f32[3], index: 1, kind: input, shape index: {}]   ;;  %s194_s2 = inlined_call_operand.vmem [shape: f32[2,8,128], index: 2, kind: input, shape index: {}]   ;;  %s195_s3 = inlined_call_operand.vmem [shape: f32[2,3,8,128], index: 3, kind: output, shape index: {}]  }
   0x1   :  { %s16_s14 = sshll.u32 %s192_s0, 4  ;;  %s17_s14 = int_to_ptr.vmem [resolvable:$true] %s16_s14 }
   0x2   :  { %9 = vsyncpa [#allocation5], 0  ;;  %s26_s17 = sshll.u32 %s193_s1, 4  ;;  %s112_s18 = scalar_lea.vmem %s17_s14, 64  ;;  %s27_s17 = int_to_ptr.vmem [resolvable:$true] %s26_s17 }
   0x3   :  { %p113_p0 = scmp.ne.s32.totalorder %s17_s14, %s112_s18  ;;  %p117_p1 = scmp.lt.s32.totalorder %s17_s14, %s17_s14 }
   0x4   :  { %p118_p2 = scmp.lt.s32.totalorder %s112_s18, %s112_s18 }
   0x6   :  { %p119_p3 = por %p118_p2, %p117_p1 }
   0x8   :  { %p120_p4 = pnand %p119_p3, %p113_p0 }
   0xa   :  { %123 = shalt.err (!%p120_p4)
}
   0xb   :  { %s140_s19 = smov [#allocation2]   ;;  %s124_s20 = scalar_lea.vmem %s27_s17, 16 }
   0xc   :  { %19 = dma.vmem_to_smem %s17_s14, 64, %s140_s19, [#allocation3]  }
   0xd   :  { %p125_p5 = scmp.ne.s32.totalorder %s27_s17, %s124_s20  ;;  %p129_p6 = scmp.lt.s32.totalorder %s27_s17, %s27_s17 }
   0xe   :  { %p130_p7 = scmp.lt.s32.totalorder %s124_s20, %s124_s20 }
  0x10   :  { %p131_p8 = por %p130_p7, %p129_p6 }
  0x12   :  { %p132_p9 = pnand %p131_p8, %p125_p5 }
  0x14   :  { %135 = shalt.err (!%p132_p9)
}
  0x15   :  { %s141_s0 = smov [#allocation4]  }
  0x16   :  { %29 = dma.vmem_to_smem %s27_s17, 16, %s141_s0, [#allocation5]  }
  0x17   :  { %136 = dma.done.wait [#allocation3], 64  }
  0x18   :  { %137 = vsyncadd [#allocation3], 4294967232 }
  0x19   :  { %138 = dma.done.wait [#allocation5], 16  }
  0x1a   :  { %139 = vsyncadd [#allocation5], 4294967280 }
  0x1b   :  { %38 = sfence }
  0x1c   :  { %s42_s1 = sld [smem:[#allocation2]]  ;;  %s96_s21 = sld [smem:[#allocation2 + $0x1]]  ;;  %v39_v0 = vld [vmem:[%s194_s2] sm:$0xff]  ;;  %v95_v1 = vld [vmem:[%s194_s2 + $0x8] sm:$0xff] }
  0x1d   :  { %s49_s22 = sld [smem:[#allocation4]]  ;;  %s99_s24 = sld [smem:[#allocation2 + $0x81]] }
  0x1e   :  { %s98_s23 = sld [smem:[#allocation2 + $0x80]]  ;;  %s100_s25 = sld [smem:[#allocation4 + $0x1]] }
  0x1f   :  { %s104_s26 = sld [smem:[#allocation2 + $0x100]]  ;;  %s105_s27 = sld [smem:[#allocation2 + $0x101]] }
  0x20   :  { %s106_s5 = sld [smem:[#allocation4 + $0x2]] }
  0x22   :  { %v43_v2 = vstv %s42_s1  ;;  %v46_v3 = vstv %s96_s21 }
  0x23   :  { %v44_v4 = vmul.f32 %v43_v2, %v39_v0  ;;  %v47_v5 = vmul.f32 %v95_v1, %v46_v3  ;;  %v50_v6 = vstv %s49_s22  ;;  %v61_v9 = vstv %s99_s24 }
  0x24   :  { %v58_v7 = vstv %s98_s23  ;;  %97 = vst [vmem:[%s195_s3 + $0x18] sm:$0xff] %v50_v6  ;;  %v65_v10 = vstv %s100_s25  ;;  %v62_v12 = vmul.f32 %v95_v1, %v61_v9 }
  0x25   :  { %v59_v8 = vmul.f32 %v58_v7, %v39_v0  ;;  %v48_v11 = vadd.f32 %v47_v5, %v44_v4  ;;  %103 = vst [vmem:[%s195_s3 + $0x20] sm:$0xff] %v65_v10  ;;  %v74_v13 = vstv %s104_s26  ;;  %v77_v14 = vstv %s105_s27 }
  0x26   :  { %v75_v15 = vmul.f32 %v74_v13, %v39_v0  ;;  %v78_v16 = vmul.f32 %v95_v1, %v77_v14  ;;  %v81_v17 = vstv %s106_s5 }
  0x27   :  { %v51_v18 = vadd.f32 %v50_v6, %v48_v11  ;;  %v63_v19 = vadd.f32 %v62_v12, %v59_v8  ;;  %109 = vst [vmem:[%s195_s3 + $0x28] sm:$0xff] %v81_v17 }
  0x28   :  { %v79_v20 = vadd.f32 %v78_v16, %v75_v15 }
  0x29   :  { %52 = vst [vmem:[%s195_s3] sm:$0xff] %v51_v18  ;;  %v66_v21 = vadd.f32 %v65_v10, %v63_v19 }
  0x2a   :  { %v82_v22 = vadd.f32 %v81_v17, %v79_v20 }
  0x2b   :  { %101 = vst [vmem:[%s195_s3 + $0x8] sm:$0xff] %v66_v21 }
  0x2c   :  { %107 = vst [vmem:[%s195_s3 + $0x10] sm:$0xff] %v82_v22 }
  0x2d   :  { %93 = vsyncpa [#allocation3], 1 }
  0x2e   :  { %94 = vsyncpa [#allocation5], 1 }

</bundles_post_ra>
